<compile_context>
chip_gen: v7x
topology: tpu7x:2x2x1
jax: 0.10.0
libtpu: 0.0.40
codegen_flags: <defaults>
</compile_context>

<pallas_src>
import math

import jax
import jax.numpy as jnp
from jax.experimental import pallas as pl
from jax.experimental.pallas import tpu as pltpu

_LN_EPS = 1e-5


def _joint_embedding_kernel(ids_ref, tok_hbm, extra_ref, gamma_ref, beta_ref,
                            out_ref, tok_buf, copy_sems):
    # ids_ref:   SMEM (N,)   int32   -- flat token ids (scalar prefetch)
    # tok_hbm:   HBM  (V, H)         -- token embedding table (never VMEM-resident)
    # extra_ref: VMEM (S, H) float32 -- precomputed segment + positional encoding
    # gamma_ref: VMEM (1, H) float32 -- LayerNorm weight
    # beta_ref:  VMEM (1, H) float32 -- LayerNorm bias
    # out_ref:   VMEM (TB, H) float32 block of the flat (N, H) output
    # tok_buf:   VMEM (TB, H) scratch for the gathered embedding rows
    # copy_sems: DMA semaphores, one per gathered row
    TB, H = out_ref.shape
    S = extra_ref.shape[0]
    rows = TB // S                       # whole sequences handled per grid step
    base = pl.program_id(0) * TB         # first flat-token index of this block

    # ---- issue one row-gather DMA per token (table stays in HBM) -------------
    @pl.loop(0, TB)
    def _issue(t):
        tid = ids_ref[base + t]
        pltpu.make_async_copy(
            tok_hbm.at[pl.ds(tid, 1)],       # (1, H) row of the HBM table
            tok_buf.at[pl.ds(t, 1)],         # (1, H) row of the VMEM scratch
            copy_sems.at[t],
        ).start()

    # ---- wait for all gathers -------------------------------------------------
    @pl.loop(0, TB)
    def _wait(t):
        pltpu.make_async_copy(
            tok_hbm.at[pl.ds(0, 1)],         # same-shaped descriptor for the wait
            tok_buf.at[pl.ds(t, 1)],
            copy_sems.at[t],
        ).wait()

    # ---- add batch-invariant (segment + position) term ------------------------
    tok = tok_buf[...].astype(jnp.float32)                    # (TB, H)
    extra = jnp.tile(extra_ref[...], (rows, 1))               # (TB, H)
    x = tok + extra

    # ---- fused single-pass LayerNorm over the hidden dimension ---------------
    s1 = jnp.sum(x, axis=-1, keepdims=True)
    s2 = jnp.sum(x * x, axis=-1, keepdims=True)
    mean = s1 * (1.0 / H)
    var = s2 * (1.0 / H) - mean * mean
    inv = jax.lax.rsqrt(var + jnp.float32(_LN_EPS))
    y = (x - mean) * inv * gamma_ref[...] + beta_ref[...]
    out_ref[...] = y.astype(out_ref.dtype)


def _rows_per_step(B, S, target_tokens=512):
    """Largest divisor of B whose token block (rows*S) is <= target and 8-aligned."""
    best = B                              # full-extent block is always legal
    for d in range(1, B + 1):
        if B % d != 0:
            continue
        if d * S > max(S, target_tokens):
            continue
        if (d * S) % 8 != 0 and d != B:
            continue
        best = d
    return best


def _segment_plus_position(S, H, seg_emb):
    """Batch-invariant (S, H) term: segment embedding + sinusoidal position encoding."""
    # Segment ids: 0 for positions <= S//2, 1 for positions >= S//2 + 1 (PyTorch ref).
    seg_ids = (jnp.arange(S) >= S // 2 + 1).astype(jnp.int32)
    seg = jnp.take(seg_emb.astype(jnp.float32), seg_ids, axis=0)        # only rows 0/1 read
    # Sinusoidal encoding, matching the reference math exactly.
    p = jnp.arange(S, dtype=jnp.float32)[:, None]                        # (S, 1)
    i = jnp.arange(H)
    expo = 2.0 * i.astype(jnp.float32) / H
    angle = p / (10000.0 ** expo)                                        # (S, H)
    pos = jnp.where(i % 2 == 0, jnp.sin(angle), jnp.cos(angle))
    return (seg + pos).astype(jnp.float32)


def joint_embedding(ids, tok_emb, seg_emb, gamma, beta, *, target_tokens=512):
    """ids: (B, S) int; tok_emb/seg_emb: (V, H); gamma/beta: (H,).  Returns (B, S, H) f32."""
    B, S = ids.shape
    V, H = tok_emb.shape
    N = B * S
    rows = _rows_per_step(B, S, target_tokens)
    TB = rows * S

    ids_flat = ids.astype(jnp.int32).reshape(N)
    extra = _segment_plus_position(S, H, seg_emb)                        # (S, H) f32
    gamma2 = gamma.reshape(1, H).astype(jnp.float32)
    beta2 = beta.reshape(1, H).astype(jnp.float32)

    out_flat = pl.pallas_call(
        _joint_embedding_kernel,
        out_shape=jax.ShapeDtypeStruct((N, H), jnp.float32),
        grid_spec=pltpu.PrefetchScalarGridSpec(
            num_scalar_prefetch=1,                       # ids -> SMEM before the grid runs
            grid=(N // TB,),
            in_specs=[
                pl.BlockSpec(memory_space=pl.ANY),               # token table stays in HBM
                pl.BlockSpec((S, H), lambda i, ids: (0, 0)),     # seg+pos, batch-invariant
                pl.BlockSpec((1, H), lambda i, ids: (0, 0)),     # gamma
                pl.BlockSpec((1, H), lambda i, ids: (0, 0)),     # beta
            ],
            out_specs=pl.BlockSpec((TB, H), lambda i, ids: (i, 0)),
            scratch_shapes=[
                pltpu.VMEM((TB, H), tok_emb.dtype),              # gathered embedding rows
                pltpu.SemaphoreType.DMA((TB,)),                  # one sem per gathered row
            ],
        ),
        compiler_params=pltpu.CompilerParams(
            dimension_semantics=("parallel",),
        ),
    )(ids_flat, tok_emb, extra, gamma2, beta2)
    # TODO(synk): overlap next-block row-gather DMAs with the current block's LayerNorm
    # (manual double-buffering of tok_buf) if the gather latency ever shows up in traces.
    return out_flat.reshape(B, S, H)


def ref_joint_embedding(ids, tok_emb, seg_emb, gamma, beta):
    """Pure-JAX reference mirroring the PyTorch forward."""
    B, S = ids.shape
    V, H = tok_emb.shape
    tok = tok_emb[ids].astype(jnp.float32)                               # (B, S, H)
    seg_ids = (jnp.arange(S) >= S // 2 + 1).astype(jnp.int32)
    seg = seg_emb[seg_ids].astype(jnp.float32)                           # (S, H)
    p = jnp.arange(S, dtype=jnp.float32)[:, None]
    i = jnp.arange(H)
    expo = 2.0 * i.astype(jnp.float32) / H
    angle = p / (10000.0 ** expo)
    pos = jnp.where(i % 2 == 0, jnp.sin(angle), jnp.cos(angle))          # (S, H)
    x = tok + seg[None] + pos[None]
    mean = x.mean(-1, keepdims=True)
    var = ((x - mean) ** 2).mean(-1, keepdims=True)
    return (x - mean) / jnp.sqrt(var + _LN_EPS) * gamma + beta


if __name__ == "__main__":
    B, S, H, V = 2, 8, 32, 64   # batch=2, seq=8, hidden=32, vocab=64

    key = jax.random.PRNGKey(0)
    k_ids, k_tok, k_seg = jax.random.split(key, 3)
    ids = jax.random.randint(k_ids, (B, S), 0, V, dtype=jnp.int32)
    # nn.Embedding default init: N(0, 1); nn.LayerNorm default: weight=1, bias=0.
    tok_emb = jax.random.normal(k_tok, (V, H), dtype=jnp.float32)
    seg_emb = jax.random.normal(k_seg, (V, H), dtype=jnp.float32)
    gamma = jnp.ones((H,), jnp.float32)
    beta = jnp.zeros((H,), jnp.float32)

    out = joint_embedding(ids, tok_emb, seg_emb, gamma, beta)
    out = jax.block_until_ready(out)

    ref = ref_joint_embedding(ids, tok_emb, seg_emb, gamma, beta)
    assert out.shape == (B, S, H) and out.dtype == jnp.float32
    assert jnp.allclose(out, ref, atol=1e-4, rtol=1e-4), "mismatch vs reference"

    print("KERNEL_OK")
</pallas_src>

<mosaic_0001>
module attributes {stable_mosaic.version = 11 : i64} {
  func.func @_joint_embedding_kernel(%arg0: i32, %arg1: memref<16xi32, #tpu.memory_space<smem>>, %arg2: memref<64x32xf32, #tpu.memory_space<any>>, %arg3: memref<8x32xf32, #tpu.memory_space<vmem>>, %arg4: memref<1x32xf32, #tpu.memory_space<vmem>>, %arg5: memref<1x32xf32, #tpu.memory_space<vmem>>, %arg6: memref<16x32xf32, #tpu.memory_space<vmem>>, %arg7: memref<16x32xf32, #tpu.memory_space<vmem>>, %arg8: memref<16x!tpu.dma_semaphore, #tpu.memory_space<semaphore_mem>>) attributes {dimension_semantics = [#tpu.dimension_semantics<parallel>], iteration_bounds = array<i64: 1>, scalar_prefetch = 1 : i64, scratch_operands = 2 : i64, tpu.core_type = #tpu.core_type<tc>, window_params = [{}, {pipeline_mode = #tpu.pipeline_mode<synchronous>, transform_indices = @transform_1, window_bounds = array<i64: 8, 32>}, {pipeline_mode = #tpu.pipeline_mode<synchronous>, transform_indices = @transform_2, window_bounds = array<i64: 1, 32>}, {pipeline_mode = #tpu.pipeline_mode<synchronous>, transform_indices = @transform_3, window_bounds = array<i64: 1, 32>}, {transform_indices = @transform_4, window_bounds = array<i64: 16, 32>}]} {
    %c16_i32 = arith.constant 16 : i32
    %0 = arith.muli %arg0, %c16_i32 : i32
    %c0_i32 = arith.constant 0 : i32
    %c16_i32_0 = arith.constant 16 : i32
    %1 = arith.addi %c0_i32, %c16_i32_0 : i32
    %c1_i32 = arith.constant 1 : i32
    scf.for %arg9 = %c0_i32 to %1 step %c1_i32  : i32 {
      %c1_i32_19 = arith.constant 1 : i32
      %32 = arith.muli %arg9, %c1_i32_19 : i32
      %c0_i32_20 = arith.constant 0 : i32
      %33 = arith.addi %c0_i32_20, %32 : i32
      %34 = arith.addi %0, %33 : i32
      %35 = arith.index_cast %34 : i32 to index
      %36 = memref.load %arg1[%35] : memref<16xi32, #tpu.memory_space<smem>>
      %c0_i32_21 = arith.constant 0 : i32
      %37 = tpu.memref_slice %arg2[%36, %c0_i32_21] : memref<64x32xf32, #tpu.memory_space<any>> -> memref<1x32xf32, #tpu.memory_space<any>>
      %c0_i32_22 = arith.constant 0 : i32
      %38 = tpu.memref_slice %arg7[%33, %c0_i32_22] : memref<16x32xf32, #tpu.memory_space<vmem>> -> memref<1x32xf32, #tpu.memory_space<vmem>>
      %39 = tpu.memref_slice %arg8[%33] : memref<16x!tpu.dma_semaphore, #tpu.memory_space<semaphore_mem>> -> memref<1x!tpu.dma_semaphore, #tpu.memory_space<semaphore_mem>>
      %40 = tpu.memref_squeeze %39 : memref<1x!tpu.dma_semaphore, #tpu.memory_space<semaphore_mem>> -> memref<!tpu.dma_semaphore, #tpu.memory_space<semaphore_mem>>
      tpu.enqueue_dma source(%37 : memref<1x32xf32, #tpu.memory_space<any>>) target(%38 : memref<1x32xf32, #tpu.memory_space<vmem>>) target_semaphore(%40 : memref<!tpu.dma_semaphore, #tpu.memory_space<semaphore_mem>>)
    }
    %c16_i32_1 = arith.constant 16 : i32
    %c0_i32_2 = arith.constant 0 : i32
    %c16_i32_3 = arith.constant 16 : i32
    %2 = arith.addi %c0_i32_2, %c16_i32_3 : i32
    %c1_i32_4 = arith.constant 1 : i32
    scf.for %arg9 = %c0_i32_2 to %2 step %c1_i32_4  : i32 {
      %c1_i32_19 = arith.constant 1 : i32
      %32 = arith.muli %arg9, %c1_i32_19 : i32
      %c0_i32_20 = arith.constant 0 : i32
      %33 = arith.addi %c0_i32_20, %32 : i32
      %c0_i32_21 = arith.constant 0 : i32
      %c0_i32_22 = arith.constant 0 : i32
      %34 = tpu.memref_slice %arg2[%c0_i32_21, %c0_i32_22] : memref<64x32xf32, #tpu.memory_space<any>> -> memref<1x32xf32, #tpu.memory_space<any>>
      %c0_i32_23 = arith.constant 0 : i32
      %35 = tpu.memref_slice %arg7[%33, %c0_i32_23] : memref<16x32xf32, #tpu.memory_space<vmem>> -> memref<1x32xf32, #tpu.memory_space<vmem>>
      %36 = tpu.memref_slice %arg8[%33] : memref<16x!tpu.dma_semaphore, #tpu.memory_space<semaphore_mem>> -> memref<1x!tpu.dma_semaphore, #tpu.memory_space<semaphore_mem>>
      %37 = tpu.memref_squeeze %36 : memref<1x!tpu.dma_semaphore, #tpu.memory_space<semaphore_mem>> -> memref<!tpu.dma_semaphore, #tpu.memory_space<semaphore_mem>>
      tpu.wait_dma2 semaphore(%37 : memref<!tpu.dma_semaphore, #tpu.memory_space<semaphore_mem>>) src(%34 : memref<1x32xf32, #tpu.memory_space<any>>) dst(%35 : memref<1x32xf32, #tpu.memory_space<vmem>>)
    }
    %c16_i32_5 = arith.constant 16 : i32
    %c0 = arith.constant 0 : index
    %c0_6 = arith.constant 0 : index
    %3 = vector.load %arg7[%c0, %c0_6] : memref<16x32xf32, #tpu.memory_space<vmem>>, vector<16x32xf32>
    %c0_7 = arith.constant 0 : index
    %c0_8 = arith.constant 0 : index
    %4 = vector.load %arg3[%c0_7, %c0_8] : memref<8x32xf32, #tpu.memory_space<vmem>>, vector<8x32xf32>
    %5 = tpu.concatenate %4, %4 in 0 : vector<8x32xf32>, vector<8x32xf32> -> vector<16x32xf32>
    %6 = arith.addf %3, %5 : vector<16x32xf32>
    %cst = arith.constant dense<0.000000e+00> : vector<16xf32>
    %7 = vector.multi_reduction <add>, %6, %cst [1] : vector<16x32xf32> to vector<16xf32>
    %8 = vector.shape_cast %7 : vector<16xf32> to vector<16x1xf32>
    %9 = arith.mulf %6, %6 : vector<16x32xf32>
    %cst_9 = arith.constant dense<0.000000e+00> : vector<16xf32>
    %10 = vector.multi_reduction <add>, %9, %cst_9 [1] : vector<16x32xf32> to vector<16xf32>
    %11 = vector.shape_cast %10 : vector<16xf32> to vector<16x1xf32>
    %cst_10 = arith.constant 3.125000e-02 : f32
    %12 = vector.broadcast %cst_10 : f32 to vector<16x1xf32>
    %13 = arith.mulf %8, %12 : vector<16x1xf32>
    %cst_11 = arith.constant 3.125000e-02 : f32
    %14 = vector.broadcast %cst_11 : f32 to vector<16x1xf32>
    %15 = arith.mulf %11, %14 : vector<16x1xf32>
    %16 = arith.mulf %13, %13 : vector<16x1xf32>
    %17 = arith.subf %15, %16 : vector<16x1xf32>
    %cst_12 = arith.constant 9.99999974E-6 : f32
    %18 = vector.broadcast %cst_12 : f32 to vector<16x1xf32>
    %19 = arith.addf %17, %18 : vector<16x1xf32>
    %20 = math.rsqrt %19 : vector<16x1xf32>
    %21 = vector.broadcast %13 : vector<16x1xf32> to vector<16x32xf32>
    %22 = arith.subf %6, %21 : vector<16x32xf32>
    %23 = vector.broadcast %20 : vector<16x1xf32> to vector<16x32xf32>
    %24 = arith.mulf %22, %23 : vector<16x32xf32>
    %c0_13 = arith.constant 0 : index
    %c0_14 = arith.constant 0 : index
    %25 = vector.load %arg4[%c0_13, %c0_14] : memref<1x32xf32, #tpu.memory_space<vmem>>, vector<1x32xf32>
    %26 = vector.broadcast %25 : vector<1x32xf32> to vector<16x32xf32>
    %27 = arith.mulf %24, %26 : vector<16x32xf32>
    %c0_15 = arith.constant 0 : index
    %c0_16 = arith.constant 0 : index
    %28 = vector.load %arg5[%c0_15, %c0_16] : memref<1x32xf32, #tpu.memory_space<vmem>>, vector<1x32xf32>
    %29 = vector.broadcast %28 : vector<1x32xf32> to vector<16x32xf32>
    %30 = arith.addf %27, %29 : vector<16x32xf32>
    %c0_17 = arith.constant 0 : index
    %c0_18 = arith.constant 0 : index
    %31 = vector.load %arg6[%c0_17, %c0_18] : memref<16x32xf32, #tpu.memory_space<vmem>>, vector<16x32xf32>
    tpu.vector_store %arg6[%c0_17, %c0_18], %30 {strides = array<i32>} : memref<16x32xf32, #tpu.memory_space<vmem>>, vector<16x32xf32>,
    return
  }
  func.func @transform_1(%arg0: i32, %arg1: memref<16xi32, #tpu.memory_space<smem>>) -> (i32, i32) {
    %c0_i32 = arith.constant 0 : i32
    %c0_i32_0 = arith.constant 0 : i32
    %c0_i32_1 = arith.constant 0 : i32
    return %c0_i32, %c0_i32_0 : i32, i32
  }
  func.func @transform_2(%arg0: i32, %arg1: memref<16xi32, #tpu.memory_space<smem>>) -> (i32, i32) {
    %c0_i32 = arith.constant 0 : i32
    %c0_i32_0 = arith.constant 0 : i32
    %c0_i32_1 = arith.constant 0 : i32
    return %c0_i32, %c0_i32_0 : i32, i32
  }
  func.func @transform_3(%arg0: i32, %arg1: memref<16xi32, #tpu.memory_space<smem>>) -> (i32, i32) {
    %c0_i32 = arith.constant 0 : i32
    %c0_i32_0 = arith.constant 0 : i32
    %c0_i32_1 = arith.constant 0 : i32
    return %c0_i32, %c0_i32_0 : i32, i32
  }
  func.func @transform_4(%arg0: i32, %arg1: memref<16xi32, #tpu.memory_space<smem>>) -> (i32, i32) {
    %c0_i32 = arith.constant 0 : i32
    %c0_i32_0 = arith.constant 0 : i32
    return %arg0, %c0_i32 : i32, i32
  }
}

</mosaic_0001>

<bundles_post_ra>
// kernel: tpu_custom_call.1
= control target key start
LH: loop header
LB: loop body
LE: loop exit
PB: predicated region body
PF: predicated region fallthrough
CT: control target
= control target key end

     0   :  { %s461_s0 = inlined_call_operand.vmem [shape: s32[16], index: 0, kind: input, shape index: {}]   ;;  %s462_s1 = inlined_call_operand.vmem [shape: f32[64,32], index: 1, kind: input, shape index: {}]   ;;  %s463_s2 = inlined_call_operand.vmem [shape: f32[8,32], index: 2, kind: input, shape index: {}]   ;;  %s464_s3 = inlined_call_operand.vmem [shape: f32[1,32], index: 3, kind: input, shape index: {}]   ;;  %s465_s4 = inlined_call_operand.vmem [shape: f32[1,32], index: 4, kind: input, shape index: {}]   ;;  %s466_s5 = inlined_call_operand.hbm [shape: f32[16,32], index: 5, kind: output, shape index: {}]  }
   0x1   :  { %s10_s20 = sshll.u32 %s461_s0, 4  ;;  %s11_s20 = int_to_ptr.vmem [resolvable:$true] %s10_s20 }
   0x2   :  { %s338_s21 = scalar_lea.vmem %s11_s20, 16  ;;  %p343_p1 = scmp.lt.s32.totalorder %s11_s20, %s11_s20 }
   0x3   :  { %p339_p0 = scmp.ne.s32.totalorder %s11_s20, %s338_s21  ;;  %p344_p2 = scmp.lt.s32.totalorder %s338_s21, %s338_s21 }
   0x5   :  { %p345_p3 = por %p344_p2, %p343_p1 }
   0x7   :  { %p346_p4 = pnand %p345_p3, %p339_p0 }
   0x9   :  { %349 = shalt.err (!%p346_p4)  }
   0xa   :  { %s394_s22 = smov [#allocation5]  }
   0xb   :  { %13 = dma.vmem_to_smem %s11_s20, 16, %s394_s22, [#allocation4] }
   0xc   :  { %380 = dma.done.wait [#allocation4], 16 }
   0xd   :  { %381 = vsyncadd [#allocation4], 4294967280 }
   0xe   :  { %15 = sfence }
   0xf   :  { %16 = vsyncpa [#allocation7], 0  ;;  %s386_s23 = smov 0  }
  0x10 LB: > { %s31_s24 = sld [smem:[#allocation5 + %s388_s23]]  ;;  %s33_s27 = scalar_lea.vmem [#allocation2], %s388_s23  ;;  %s388_s23 = sphi %s386_s23, %s29_s23  }
  0x11   : > { %s34_s28 = scalar_lea.sflag [#allocation3], %s388_s23 }
  0x16   : > { %s32_s26 = scalar_lea.vmem %s462_s1, %s31_s24 }
  0x17   : > { %v52_v0 = vld [vmem:[%s32_s26] sm:$0x1] }
  0x18   : > { %53 = vst [vmem:[%s33_s27] sm:$0x1] %v52_v0 }
  0x19   : > { %78 = vsyncadd %s34_s28, 16  ;;  %s29_s23 = sadd.s32 1, %s388_s23  }
  0x1a   : > { %p26_p5 = scmp.ge.s32.totalorder %s29_s23, 16  }
  0x1b   :  { %s390_s29 = smov (%p26_p5), 0  }
  0x1c   :  { %28 = sbr.rel (!%p26_p5) target bundleno = 16 (0x10), region = 105 }
  0x23 LB: > { %s85_s30 = scalar_lea.sflag [#allocation3], %s392_s29  ;;  %s392_s29 = sphi %s390_s29, %s84_s29  }
  0x24   : > { %382 = dma.done.wait %s85_s30, 16 }
  0x25   : > { %383 = vsyncadd %s85_s30, 4294967280  ;;  %s84_s29 = sadd.s32 1, %s392_s29  }
  0x26   : > { %p81_p6 = scmp.ge.s32.totalorder %s84_s29, 16  }
  0x27   :  { %v89_v1 = vld [vmem:[#allocation2] sm:$0xff] (%p81_p6)  ;;  %vm94_vm0 = vcmask (%p81_p6), 261120   ;;  %v90_v3 = vld [vmem:[#allocation2 + $0x8] sm:$0xff] (%p81_p6)  ;;  %s395_s10 = smov (%p81_p6), [#allocation6]  }
  0x28   :  { %83 = sbr.rel (!%p81_p6) target bundleno = 35 (0x23), region = 116  ;;  %v91_v2 = vld [vmem:[%s463_s2] sm:$0xff] (%p81_p6)  ;;  %s150_s11 = sshll.u32 (%p81_p6), %s395_s10, 4  ;;  %s151_s11 = int_to_ptr.vmem [resolvable:$true] %s150_s11 }
  0x29   :  { %v92_v4 = vadd.f32 (%p81_p6), %v91_v2, %v89_v1  ;;  %v93_v5 = vadd.f32 (%p81_p6), %v91_v2, %v90_v3  ;;  %v296_v28 = vld [vmem:[%s464_s3] ss:$0 sm:$0xff] (%p81_p6)  ;;  %s350_s3 = scalar_lea.vmem (%p81_p6), %s151_s11, 256  ;;  %p355_p8 = scmp.lt.s32.totalorder (%p81_p6), %s151_s11, %s151_s11 }
  0x2a   :  { %v297_v30 = vld [vmem:[%s465_s4] ss:$0 sm:$0xff] (%p81_p6)  ;;  %p351_p7 = scmp.ne.s32.totalorder (%p81_p6), %s151_s11, %s350_s3  ;;  %p356_p9 = scmp.lt.s32.totalorder (%p81_p6), %s350_s3, %s350_s3 }
  0x2b   :  { %v95_v6 = vsel (%p81_p6), %vm94_vm0, %v92_v4, 0.0  ;;  %v101_v7 = vmul.f32 (%p81_p6), %v92_v4, %v92_v4  ;;  %v102_v8 = vmul.f32 (%p81_p6), %v93_v5, %v93_v5  ;;  %v98_v10 = vsel (%p81_p6), %vm94_vm0, %v93_v5, 0.0 }
  0x2c   :  { %96 = vadd.xlane.f32.xlu0 (%p81_p6), %v95_v6  ;;  %p357_p10 = por (%p81_p6), %p356_p9, %p355_p8 }
  0x2d   :  { %v103_v9 = vsel (%p81_p6), %vm94_vm0, %v101_v7, 0.0  ;;  %v106_v11 = vsel (%p81_p6), %vm94_vm0, %v102_v8, 0.0 }
  0x2e   :  { %104 = vadd.xlane.f32.xlu1 (%p81_p6), %v103_v9  ;;  %p358_p11 = pnand (%p81_p6), %p357_p10, %p351_p7 }
  0x30   :  { %99 = vadd.xlane.f32.xlu0 %v98_v10 }
  0x32   :  { %107 = vadd.xlane.f32.xlu1 %v106_v11 }
  0xb9   :  { %v97_v12 = vpop.xlane.xlu0 %96 }
  0xba   :  { %v109_v13 = vmul.f32 0.03125, %v97_v12 }
  0xbb   :  { %v105_v14 = vpop.xlane.xlu1 %104 }
  0xbc   :  { %v113_v15 = vmul.f32 %v109_v13, %v109_v13  ;;  %v111_v16 = vmul.f32 0.03125, %v105_v14  ;;  %v121_v26 = vsub.f32 %v92_v4, %v109_v13 }
  0xbd   :  { %v100_v17 = vpop.xlane.xlu0 %99 }
  0xbe   :  { %v115_v18 = vsub.f32 %v111_v16, %v113_v15  ;;  %v110_v19 = vmul.f32 0.03125, %v100_v17 }
  0xbf   :  { %v108_v20 = vpop.xlane.xlu1 %107 }
  0xc0   :  { %v117_v21 = vadd.f32 1e-05, %v115_v18  ;;  %v114_v22 = vmul.f32 %v110_v19, %v110_v19  ;;  %v112_v23 = vmul.f32 0.03125, %v108_v20  ;;  %v122_v31 = vsub.f32 %v93_v5, %v110_v19 }
  0xc2   :  { %334 = vrsqrt.f32 %v117_v21  ;;  %v116_v24 = vsub.f32 %v112_v23, %v114_v22 }
  0xc4   :  { %v118_v25 = vadd.f32 1e-05, %v116_v24 }
  0xc6   :  { %336 = vrsqrt.f32 %v118_v25 }
  0xcc   :  { %v335_v27 = vpop.eup %334 }
  0xcd   :  { %v123_v29 = vmul.f32 %v335_v27, %v121_v26 }
  0xcf   :  { %v132_v32 = vmul.f32 %v296_v28, %v123_v29 }
  0xd0   :  { %v337_v33 = vpop.eup %336 }
  0xd1   :  { %v124_v34 = vmul.f32 %v337_v33, %v122_v31  ;;  %v141_v35 = vadd.f32 %v297_v30, %v132_v32 }
  0xd3   :  { %v133_v36 = vmul.f32 %v296_v28, %v124_v34  ;;  %143 = vst.msk [vmem:[#allocation6] sm:$0xff] %vm94_vm0, %v141_v35 }
  0xd5   :  { %v142_v37 = vadd.f32 %v297_v30, %v133_v36 }
  0xd7   :  { %144 = vst.msk [vmem:[#allocation6 + $0x8] sm:$0xff] %vm94_vm0, %v142_v37 }
  0xd8   :  { %361 = shalt.err (!%p358_p11)
}
  0xd9   :  { %s362_s13 = scalar_lea.hbm %s466_s5, 256 }
  0xda   :  { %p363_p12 = scmp.ne.s32.totalorder %s466_s5, %s362_s13  ;;  %p366_p13 = scmp.lt.u32.totalorder %s362_s13, %s466_s5 }
  0xdc   :  { %p368_p0 = pnand %p366_p13, %p363_p12 }
  0xde   :  { %371 = shalt.err (!%p368_p0)
}
  0xdf   :  { %s396_s18 = smov 128   ;;  %s397_s19 = smov 8  }
  0xe0   :  { %156 = dma.vmem_to_hbm [thread:$0]  %s151_s11, 256, %s466_s5, [#allocation7], %s396_s18, %s396_s18, %s397_s19  }
  0xe1   :  { %384 = dma.done.wait [#allocation7], 256  }
  0xe2   :  { %385 = vsyncadd [#allocation7], 4294967040 }
  0xe3   :  { %160 = vsyncpa [#allocation7], 1 }
  0xe4   :  { %161 = vsyncmov [#allocation3] }
  0xe7   :  { %s162_s22 = vpop.sfrf %161 }
  0xe8   :  { %p298_p1 = scmp.ne.s32.totalorder %s162_s22, 0 }
  0xea   :  { %166 = shalt.err (%p298_p1)  }
  0xeb   :  { %168 = vsyncmov [#allocation3 + $0x1] }
  0xee   :  { %s169_s23 = vpop.sfrf %168 }
  0xef   :  { %p299_p2 = scmp.ne.s32.totalorder %s169_s23, 0 }
  0xf1   :  { %173 = shalt.err (%p299_p2)  }
  0xf2   :  { %175 = vsyncmov [#allocation3 + $0x2] }
  0xf5   :  { %s176_s24 = vpop.sfrf %175 }
  0xf6   :  { %p300_p3 = scmp.ne.s32.totalorder %s176_s24, 0 }
  0xf8   :  { %180 = shalt.err (%p300_p3)  }
  0xf9   :  { %182 = vsyncmov [#allocation3 + $0x3] }
  0xfc   :  { %s183_s0 = vpop.sfrf %182 }
  0xfd   :  { %p301_p4 = scmp.ne.s32.totalorder %s183_s0, 0 }
  0xff   :  { %187 = shalt.err (%p301_p4)  }
 0x100   :  { %189 = vsyncmov [#allocation3 + $0x4] }
 0x103   :  { %s190_s5 = vpop.sfrf %189 }
 0x104   :  { %p302_p5 = scmp.ne.s32.totalorder %s190_s5, 0 }
 0x106   :  { %194 = shalt.err (%p302_p5)  }
 0x107   :  { %196 = vsyncmov [#allocation3 + $0x5] }
 0x10a   :  { %s197_s25 = vpop.sfrf %196 }
 0x10b   :  { %p303_p6 = scmp.ne.s32.totalorder %s197_s25, 0 }
 0x10d   :  { %201 = shalt.err (%p303_p6)  }
 0x10e   :  { %203 = vsyncmov [#allocation3 + $0x6] }
 0x111   :  { %s204_s26 = vpop.sfrf %203 }
 0x112   :  { %p304_p7 = scmp.ne.s32.totalorder %s204_s26, 0 }
 0x114   :  { %208 = shalt.err (%p304_p7)  }
 0x115   :  { %210 = vsyncmov [#allocation3 + $0x7] }
 0x118   :  { %s211_s27 = vpop.sfrf %210 }
 0x119   :  { %p305_p8 = scmp.ne.s32.totalorder %s211_s27, 0 }
 0x11b   :  { %215 = shalt.err (%p305_p8)  }
 0x11c   :  { %217 = vsyncmov [#allocation3 + $0x8] }
 0x11f   :  { %s218_s28 = vpop.sfrf %217 }
 0x120   :  { %p306_p9 = scmp.ne.s32.totalorder %s218_s28, 0 }
 0x122   :  { %222 = shalt.err (%p306_p9)  }
 0x123   :  { %224 = vsyncmov [#allocation3 + $0x9] }
 0x126   :  { %s225_s29 = vpop.sfrf %224 }
 0x127   :  { %p307_p10 = scmp.ne.s32.totalorder %s225_s29, 0 }
 0x129   :  { %229 = shalt.err (%p307_p10)  }
 0x12a   :  { %231 = vsyncmov [#allocation3 + $0xa] }
 0x12d   :  { %s232_s30 = vpop.sfrf %231 }
 0x12e   :  { %p308_p11 = scmp.ne.s32.totalorder %s232_s30, 0 }
 0x130   :  { %236 = shalt.err (%p308_p11)  }
 0x131   :  { %238 = vsyncmov [#allocation3 + $0xb] }
 0x134   :  { %s239_s6 = vpop.sfrf %238 }
 0x135   :  { %p309_p12 = scmp.ne.s32.totalorder %s239_s6, 0 }
 0x137   :  { %243 = shalt.err (%p309_p12)  }
 0x138   :  { %245 = vsyncmov [#allocation3 + $0xc] }
 0x13b   :  { %s246_s7 = vpop.sfrf %245 }
 0x13c   :  { %p310_p13 = scmp.ne.s32.totalorder %s246_s7, 0 }
 0x13e   :  { %250 = shalt.err (%p310_p13)  }
 0x13f   :  { %252 = vsyncmov [#allocation3 + $0xd] }
 0x142   :  { %s253_s1 = vpop.sfrf %252 }
 0x143   :  { %p311_p0 = scmp.ne.s32.totalorder %s253_s1, 0 }
 0x145   :  { %257 = shalt.err (%p311_p0)  }
 0x146   :  { %259 = vsyncmov [#allocation3 + $0xe] }
 0x149   :  { %s260_s2 = vpop.sfrf %259 }
 0x14a   :  { %p312_p1 = scmp.ne.s32.totalorder %s260_s2, 0 }
 0x14c   :  { %264 = shalt.err (%p312_p1)  }
 0x14d   :  { %266 = vsyncmov [#allocation3 + $0xf] }
 0x150   :  { %s267_s8 = vpop.sfrf %266 }
 0x151   :  { %p313_p2 = scmp.ne.s32.totalorder %s267_s8, 0 }
 0x153   :  { %271 = shalt.err (%p313_p2)  }

</bundles_post_ra>
